<compile_context>
chip_gen: v5e
topology: v5e:2x2
jax: 0.10.0
libtpu: 0.0.40
codegen_flags: <defaults>
</compile_context>

<pallas_src>
import math

import jax
import jax.numpy as jnp
from jax.experimental import pallas as pl
from jax.experimental.pallas import tpu as pltpu


# --------------------------------------------------------------------------
# Hardware queries / tiling policy
# --------------------------------------------------------------------------
def _vmem_capacity_bytes():
    """Physical VMEM capacity; conservative 64 MiB (v7x) fallback."""
    try:
        cap = int(pltpu.get_tpu_info().vmem_capacity_bytes)
        if cap > 0:
            return cap
    except Exception:
        pass
    return 64 * 1024 * 1024


def _sublane_multiple(dtype):
    """Dtype-aware sublane alignment: 8 (f32), 16 (bf16), 32 (int8/fp8)."""
    return max(8, 32 // jnp.dtype(dtype).itemsize)


def _pick_batch_block(batch, n_features, feat_dim, dtype):
    """Largest sublane-aligned batch tile within the per-step DMA budget.

    Budget is generation-aware (~20% of VMEM single-buffered, ~40% with the
    double-buffered pipeline).  When the batch is large enough we also keep at
    least 2 grid steps so the "parallel" batch axis shards across v7x's two
    TensorCores.
    """
    itemsize = jnp.dtype(dtype).itemsize
    sublane = _sublane_multiple(dtype)

    step_budget = max(_vmem_capacity_bytes() // 5, 4 * 1024 * 1024)
    per_row = (n_features + 1) * feat_dim * itemsize  # N inputs + 1 output
    tb = max(sublane, step_budget // per_row)

    if batch >= 2 * sublane:
        # Never collapse to a single grid step: cap at ceil(B/2) rounded up
        # to the sublane multiple (megacore sharding on v7x; ~free on 1-TC).
        half = -(-pl.cdiv(batch, 2) // sublane) * sublane
        tb = min(tb, half)

    if tb >= batch:
        return batch  # full extent: (8,128) rule trivially satisfied
    return min(batch, max(sublane, (tb // sublane) * sublane))


# --------------------------------------------------------------------------
# Kernel
# --------------------------------------------------------------------------
def _tree_sum(terms):
    """Pairwise (tree) sum to expose ILP instead of a serial add chain."""
    terms = list(terms)
    while len(terms) > 1:
        nxt = [terms[i] + terms[i + 1] for i in range(0, len(terms) - 1, 2)]
        if len(terms) % 2:
            nxt.append(terms[-1])
        terms = nxt
    return terms[0]


def _make_kernel(n_features):
    """Kernel over one batch tile: fused max -> attention MLP -> gated mean."""

    def kernel(*refs):
        fs = refs[:n_features]                                # N x (TB, D) VMEM
        w1_ref, b1_ref, w2_ref, b2_ref = refs[n_features:-1]  # SMEM params
        out_ref = refs[-1]                                    # (TB, D) VMEM

        feat_dtype = fs[0].dtype
        low_prec_float = (jnp.issubdtype(feat_dtype, jnp.floating)
                          and jnp.dtype(feat_dtype).itemsize < 4)

        # Per-feature max over the lane (feature) axis, in native dtype
        # (packed vregs for bf16); only the (TB, 1) result is cast to f32.
        t = [fs[i][...].max(axis=-1, keepdims=True).astype(jnp.float32)
             for i in range(n_features)]

        def linear(xs, w_ref, b_ref):
            # y_j = sum_k x_k * W[j, k] + b[j], scalar weights from SMEM,
            # pairwise-accumulated.
            ys = []
            for j in range(n_features):
                terms = [xs[k] * w_ref[j, k] for k in range(n_features)]
                ys.append(_tree_sum(terms) + b_ref[j])
            return ys

        # Linear(N, N) -> ReLU.
        h = [jnp.maximum(z, 0.0) for z in linear(t, w1_ref, b1_ref)]
        # Linear(N, N) -> Sigmoid (exp/logistic runs on the EUP slot).
        a = [jax.nn.sigmoid(z) for z in linear(h, w2_ref, b2_ref)]

        # Gated mean over the N features: (TB,1) gates lane-broadcast to (TB,D).
        # For sub-32-bit float features keep the full-tile multiply in the
        # native dtype and accumulate the products in f32 (halves VPU work /
        # vreg footprint on v6e/v7x bf16 VALU).
        prods = []
        for i in range(n_features):
            tile = fs[i][...]
            if low_prec_float:
                prods.append((a[i].astype(feat_dtype) * tile).astype(jnp.float32))
            else:
                prods.append(a[i] * tile.astype(jnp.float32))
        out = _tree_sum(prods) * (1.0 / n_features)
        out_ref[...] = out.astype(out_ref.dtype)

    return kernel


# --------------------------------------------------------------------------
# Wrapper
# --------------------------------------------------------------------------
def channel_fusion_attention(features, w1, b1, w2, b2, *, batch_block=None):
    """JAX/Pallas equivalent of ChannelFusionAttention.forward."""
    n = len(features)
    batch, feat_dim = features[0].shape
    for f in features:
        assert f.shape == (batch, feat_dim), "all features must share (B, D)"
    assert w1.shape == (n, n) and w2.shape == (n, n)
    assert b1.shape == (n,) and b2.shape == (n,)
    dtype = features[0].dtype
    itemsize = jnp.dtype(dtype).itemsize

    if batch_block is None:
        batch_block = _pick_batch_block(batch, n, feat_dim, dtype)
    grid = (pl.cdiv(batch, batch_block),)

    # Raise the scoped VMEM limit if the double-buffered working set needs it
    # (default scoped limits: 16 MiB v5e / 32 MiB v6e, v7x).
    working_set = 2 * (n + 1) * batch_block * feat_dim * itemsize
    vmem_cap = _vmem_capacity_bytes()
    vmem_limit = int(min(max(working_set * 5 // 4, 32 * 1024 * 1024),
                         max(vmem_cap - 8 * 1024 * 1024, 16 * 1024 * 1024)))

    feat_spec = pl.BlockSpec((batch_block, feat_dim), lambda b: (b, 0))
    smem_spec = pl.BlockSpec(memory_space=pltpu.MemorySpace.SMEM)

    return pl.pallas_call(
        _make_kernel(n),
        out_shape=jax.ShapeDtypeStruct((batch, feat_dim), dtype),
        grid=grid,
        in_specs=[feat_spec] * n + [smem_spec] * 4,
        out_specs=pl.BlockSpec((batch_block, feat_dim), lambda b: (b, 0)),
        compiler_params=pltpu.CompilerParams(
            dimension_semantics=("parallel",),
            vmem_limit_bytes=vmem_limit),
    )(*features, w1, b1, w2, b2)


# --------------------------------------------------------------------------
# Reference + self-test
# --------------------------------------------------------------------------
def _reference(features, w1, b1, w2, b2):
    stacked = jnp.stack(features, axis=1)                            # (B, N, D)
    t = stacked.max(axis=-1)                                         # (B, N)
    h = jnp.maximum(
        jnp.dot(t, w1.T, precision=jax.lax.Precision.HIGHEST) + b1, 0.0)
    a = jax.nn.sigmoid(
        jnp.dot(h, w2.T, precision=jax.lax.Precision.HIGHEST) + b2)
    return (a[:, :, None] * stacked).mean(axis=1)                    # (B, D)


if __name__ == "__main__":
    key = jax.random.PRNGKey(0)
    k_feat, k_w1, k_b1, k_w2, k_b2 = jax.random.split(key, 5)

    # channelNumber == number of fused features; D lane-dense (multiple of 128).
    N, B, D = 4, 16, 256
    feat_keys = jax.random.split(k_feat, N)
    features = [jax.random.normal(k, (B, D), dtype=jnp.float32) for k in feat_keys]

    # Deterministic Linear params (PyTorch-style uniform(-1/sqrt(N), 1/sqrt(N))).
    bound = 1.0 / math.sqrt(N)
    w1 = jax.random.uniform(k_w1, (N, N), jnp.float32, -bound, bound)
    b1 = jax.random.uniform(k_b1, (N,), jnp.float32, -bound, bound)
    w2 = jax.random.uniform(k_w2, (N, N), jnp.float32, -bound, bound)
    b2 = jax.random.uniform(k_b2, (N,), jnp.float32, -bound, bound)

    ref = _reference(features, w1, b1, w2, b2)

    # Auto tiling: budget caps at ceil(B/2)=8-row tiles -> 2 "parallel" steps.
    out = channel_fusion_attention(features, w1, b1, w2, b2)
    jax.block_until_ready(out)
    assert out.shape == ref.shape, (out.shape, ref.shape)
    assert jnp.allclose(out, ref, rtol=1e-4, atol=1e-4), "auto-block mismatch vs reference"

    # Explicit full-batch tile: single grid step, full-extent block.
    out_full = channel_fusion_attention(features, w1, b1, w2, b2, batch_block=B)
    jax.block_until_ready(out_full)
    assert jnp.allclose(out_full, ref, rtol=1e-4, atol=1e-4), "full-block mismatch vs reference"

    print("KERNEL_OK")
</pallas_src>

<mosaic_0001>
module attributes {stable_mosaic.version = 11 : i64} {
  func.func @kernel(%arg0: i32, %arg1: memref<8x256xf32, #tpu.memory_space<vmem>>, %arg2: memref<8x256xf32, #tpu.memory_space<vmem>>, %arg3: memref<8x256xf32, #tpu.memory_space<vmem>>, %arg4: memref<8x256xf32, #tpu.memory_space<vmem>>, %arg5: memref<4x4xf32, #tpu.memory_space<smem>>, %arg6: memref<4xf32, #tpu.memory_space<smem>>, %arg7: memref<4x4xf32, #tpu.memory_space<smem>>, %arg8: memref<4xf32, #tpu.memory_space<smem>>, %arg9: memref<8x256xf32, #tpu.memory_space<vmem>>) attributes {dimension_semantics = [#tpu.dimension_semantics<parallel>], iteration_bounds = array<i64: 2>, scalar_prefetch = 0 : i64, scratch_operands = 0 : i64, tpu.core_type = #tpu.core_type<tc>, window_params = [{transform_indices = @transform_0, window_bounds = array<i64: 8, 256>}, {transform_indices = @transform_1, window_bounds = array<i64: 8, 256>}, {transform_indices = @transform_2, window_bounds = array<i64: 8, 256>}, {transform_indices = @transform_3, window_bounds = array<i64: 8, 256>}, {transform_indices = @transform_4, window_bounds = array<i64: 4, 4>}, {transform_indices = @transform_5, window_bounds = array<i64: 4>}, {transform_indices = @transform_6, window_bounds = array<i64: 4, 4>}, {transform_indices = @transform_7, window_bounds = array<i64: 4>}, {transform_indices = @transform_8, window_bounds = array<i64: 8, 256>}]} {
    %c0 = arith.constant 0 : index
    %c0_0 = arith.constant 0 : index
    %0 = vector.load %arg1[%c0, %c0_0] : memref<8x256xf32, #tpu.memory_space<vmem>>, vector<8x256xf32>
    %cst = arith.constant dense<0xFF800000> : vector<8xf32>
    %1 = vector.multi_reduction <maximumf>, %0, %cst [1] : vector<8x256xf32> to vector<8xf32>
    %2 = vector.shape_cast %1 : vector<8xf32> to vector<8x1xf32>
    %c0_1 = arith.constant 0 : index
    %c0_2 = arith.constant 0 : index
    %3 = vector.load %arg2[%c0_1, %c0_2] : memref<8x256xf32, #tpu.memory_space<vmem>>, vector<8x256xf32>
    %cst_3 = arith.constant dense<0xFF800000> : vector<8xf32>
    %4 = vector.multi_reduction <maximumf>, %3, %cst_3 [1] : vector<8x256xf32> to vector<8xf32>
    %5 = vector.shape_cast %4 : vector<8xf32> to vector<8x1xf32>
    %c0_4 = arith.constant 0 : index
    %c0_5 = arith.constant 0 : index
    %6 = vector.load %arg3[%c0_4, %c0_5] : memref<8x256xf32, #tpu.memory_space<vmem>>, vector<8x256xf32>
    %cst_6 = arith.constant dense<0xFF800000> : vector<8xf32>
    %7 = vector.multi_reduction <maximumf>, %6, %cst_6 [1] : vector<8x256xf32> to vector<8xf32>
    %8 = vector.shape_cast %7 : vector<8xf32> to vector<8x1xf32>
    %c0_7 = arith.constant 0 : index
    %c0_8 = arith.constant 0 : index
    %9 = vector.load %arg4[%c0_7, %c0_8] : memref<8x256xf32, #tpu.memory_space<vmem>>, vector<8x256xf32>
    %cst_9 = arith.constant dense<0xFF800000> : vector<8xf32>
    %10 = vector.multi_reduction <maximumf>, %9, %cst_9 [1] : vector<8x256xf32> to vector<8xf32>
    %11 = vector.shape_cast %10 : vector<8xf32> to vector<8x1xf32>
    %c0_10 = arith.constant 0 : index
    %c0_11 = arith.constant 0 : index
    %12 = memref.load %arg5[%c0_10, %c0_11] : memref<4x4xf32, #tpu.memory_space<smem>>
    %13 = vector.broadcast %12 : f32 to vector<8x1xf32>
    %14 = arith.mulf %2, %13 : vector<8x1xf32>
    %c0_12 = arith.constant 0 : index
    %c1 = arith.constant 1 : index
    %15 = memref.load %arg5[%c0_12, %c1] : memref<4x4xf32, #tpu.memory_space<smem>>
    %16 = vector.broadcast %15 : f32 to vector<8x1xf32>
    %17 = arith.mulf %5, %16 : vector<8x1xf32>
    %c0_13 = arith.constant 0 : index
    %c2 = arith.constant 2 : index
    %18 = memref.load %arg5[%c0_13, %c2] : memref<4x4xf32, #tpu.memory_space<smem>>
    %19 = vector.broadcast %18 : f32 to vector<8x1xf32>
    %20 = arith.mulf %8, %19 : vector<8x1xf32>
    %c0_14 = arith.constant 0 : index
    %c3 = arith.constant 3 : index
    %21 = memref.load %arg5[%c0_14, %c3] : memref<4x4xf32, #tpu.memory_space<smem>>
    %22 = vector.broadcast %21 : f32 to vector<8x1xf32>
    %23 = arith.mulf %11, %22 : vector<8x1xf32>
    %24 = arith.addf %14, %17 : vector<8x1xf32>
    %25 = arith.addf %20, %23 : vector<8x1xf32>
    %26 = arith.addf %24, %25 : vector<8x1xf32>
    %c0_15 = arith.constant 0 : index
    %27 = memref.load %arg6[%c0_15] : memref<4xf32, #tpu.memory_space<smem>>
    %28 = vector.broadcast %27 : f32 to vector<8x1xf32>
    %29 = arith.addf %26, %28 : vector<8x1xf32>
    %c1_16 = arith.constant 1 : index
    %c0_17 = arith.constant 0 : index
    %30 = memref.load %arg5[%c1_16, %c0_17] : memref<4x4xf32, #tpu.memory_space<smem>>
    %31 = vector.broadcast %30 : f32 to vector<8x1xf32>
    %32 = arith.mulf %2, %31 : vector<8x1xf32>
    %c1_18 = arith.constant 1 : index
    %c1_19 = arith.constant 1 : index
    %33 = memref.load %arg5[%c1_18, %c1_19] : memref<4x4xf32, #tpu.memory_space<smem>>
    %34 = vector.broadcast %33 : f32 to vector<8x1xf32>
    %35 = arith.mulf %5, %34 : vector<8x1xf32>
    %c1_20 = arith.constant 1 : index
    %c2_21 = arith.constant 2 : index
    %36 = memref.load %arg5[%c1_20, %c2_21] : memref<4x4xf32, #tpu.memory_space<smem>>
    %37 = vector.broadcast %36 : f32 to vector<8x1xf32>
    %38 = arith.mulf %8, %37 : vector<8x1xf32>
    %c1_22 = arith.constant 1 : index
    %c3_23 = arith.constant 3 : index
    %39 = memref.load %arg5[%c1_22, %c3_23] : memref<4x4xf32, #tpu.memory_space<smem>>
    %40 = vector.broadcast %39 : f32 to vector<8x1xf32>
    %41 = arith.mulf %11, %40 : vector<8x1xf32>
    %42 = arith.addf %32, %35 : vector<8x1xf32>
    %43 = arith.addf %38, %41 : vector<8x1xf32>
    %44 = arith.addf %42, %43 : vector<8x1xf32>
    %c1_24 = arith.constant 1 : index
    %45 = memref.load %arg6[%c1_24] : memref<4xf32, #tpu.memory_space<smem>>
    %46 = vector.broadcast %45 : f32 to vector<8x1xf32>
    %47 = arith.addf %44, %46 : vector<8x1xf32>
    %c2_25 = arith.constant 2 : index
    %c0_26 = arith.constant 0 : index
    %48 = memref.load %arg5[%c2_25, %c0_26] : memref<4x4xf32, #tpu.memory_space<smem>>
    %49 = vector.broadcast %48 : f32 to vector<8x1xf32>
    %50 = arith.mulf %2, %49 : vector<8x1xf32>
    %c2_27 = arith.constant 2 : index
    %c1_28 = arith.constant 1 : index
    %51 = memref.load %arg5[%c2_27, %c1_28] : memref<4x4xf32, #tpu.memory_space<smem>>
    %52 = vector.broadcast %51 : f32 to vector<8x1xf32>
    %53 = arith.mulf %5, %52 : vector<8x1xf32>
    %c2_29 = arith.constant 2 : index
    %c2_30 = arith.constant 2 : index
    %54 = memref.load %arg5[%c2_29, %c2_30] : memref<4x4xf32, #tpu.memory_space<smem>>
    %55 = vector.broadcast %54 : f32 to vector<8x1xf32>
    %56 = arith.mulf %8, %55 : vector<8x1xf32>
    %c2_31 = arith.constant 2 : index
    %c3_32 = arith.constant 3 : index
    %57 = memref.load %arg5[%c2_31, %c3_32] : memref<4x4xf32, #tpu.memory_space<smem>>
    %58 = vector.broadcast %57 : f32 to vector<8x1xf32>
    %59 = arith.mulf %11, %58 : vector<8x1xf32>
    %60 = arith.addf %50, %53 : vector<8x1xf32>
    %61 = arith.addf %56, %59 : vector<8x1xf32>
    %62 = arith.addf %60, %61 : vector<8x1xf32>
    %c2_33 = arith.constant 2 : index
    %63 = memref.load %arg6[%c2_33] : memref<4xf32, #tpu.memory_space<smem>>
    %64 = vector.broadcast %63 : f32 to vector<8x1xf32>
    %65 = arith.addf %62, %64 : vector<8x1xf32>
    %c3_34 = arith.constant 3 : index
    %c0_35 = arith.constant 0 : index
    %66 = memref.load %arg5[%c3_34, %c0_35] : memref<4x4xf32, #tpu.memory_space<smem>>
    %67 = vector.broadcast %66 : f32 to vector<8x1xf32>
    %68 = arith.mulf %2, %67 : vector<8x1xf32>
    %c3_36 = arith.constant 3 : index
    %c1_37 = arith.constant 1 : index
    %69 = memref.load %arg5[%c3_36, %c1_37] : memref<4x4xf32, #tpu.memory_space<smem>>
    %70 = vector.broadcast %69 : f32 to vector<8x1xf32>
    %71 = arith.mulf %5, %70 : vector<8x1xf32>
    %c3_38 = arith.constant 3 : index
    %c2_39 = arith.constant 2 : index
    %72 = memref.load %arg5[%c3_38, %c2_39] : memref<4x4xf32, #tpu.memory_space<smem>>
    %73 = vector.broadcast %72 : f32 to vector<8x1xf32>
    %74 = arith.mulf %8, %73 : vector<8x1xf32>
    %c3_40 = arith.constant 3 : index
    %c3_41 = arith.constant 3 : index
    %75 = memref.load %arg5[%c3_40, %c3_41] : memref<4x4xf32, #tpu.memory_space<smem>>
    %76 = vector.broadcast %75 : f32 to vector<8x1xf32>
    %77 = arith.mulf %11, %76 : vector<8x1xf32>
    %78 = arith.addf %68, %71 : vector<8x1xf32>
    %79 = arith.addf %74, %77 : vector<8x1xf32>
    %80 = arith.addf %78, %79 : vector<8x1xf32>
    %c3_42 = arith.constant 3 : index
    %81 = memref.load %arg6[%c3_42] : memref<4xf32, #tpu.memory_space<smem>>
    %82 = vector.broadcast %81 : f32 to vector<8x1xf32>
    %83 = arith.addf %80, %82 : vector<8x1xf32>
    %cst_43 = arith.constant 0.000000e+00 : f32
    %84 = vector.broadcast %cst_43 : f32 to vector<8x1xf32>
    %85 = arith.maximumf %29, %84 : vector<8x1xf32>
    %cst_44 = arith.constant 0.000000e+00 : f32
    %86 = vector.broadcast %cst_44 : f32 to vector<8x1xf32>
    %87 = arith.maximumf %47, %86 : vector<8x1xf32>
    %cst_45 = arith.constant 0.000000e+00 : f32
    %88 = vector.broadcast %cst_45 : f32 to vector<8x1xf32>
    %89 = arith.maximumf %65, %88 : vector<8x1xf32>
    %cst_46 = arith.constant 0.000000e+00 : f32
    %90 = vector.broadcast %cst_46 : f32 to vector<8x1xf32>
    %91 = arith.maximumf %83, %90 : vector<8x1xf32>
    %c0_47 = arith.constant 0 : index
    %c0_48 = arith.constant 0 : index
    %92 = memref.load %arg7[%c0_47, %c0_48] : memref<4x4xf32, #tpu.memory_space<smem>>
    %93 = vector.broadcast %92 : f32 to vector<8x1xf32>
    %94 = arith.mulf %85, %93 : vector<8x1xf32>
    %c0_49 = arith.constant 0 : index
    %c1_50 = arith.constant 1 : index
    %95 = memref.load %arg7[%c0_49, %c1_50] : memref<4x4xf32, #tpu.memory_space<smem>>
    %96 = vector.broadcast %95 : f32 to vector<8x1xf32>
    %97 = arith.mulf %87, %96 : vector<8x1xf32>
    %c0_51 = arith.constant 0 : index
    %c2_52 = arith.constant 2 : index
    %98 = memref.load %arg7[%c0_51, %c2_52] : memref<4x4xf32, #tpu.memory_space<smem>>
    %99 = vector.broadcast %98 : f32 to vector<8x1xf32>
    %100 = arith.mulf %89, %99 : vector<8x1xf32>
    %c0_53 = arith.constant 0 : index
    %c3_54 = arith.constant 3 : index
    %101 = memref.load %arg7[%c0_53, %c3_54] : memref<4x4xf32, #tpu.memory_space<smem>>
    %102 = vector.broadcast %101 : f32 to vector<8x1xf32>
    %103 = arith.mulf %91, %102 : vector<8x1xf32>
    %104 = arith.addf %94, %97 : vector<8x1xf32>
    %105 = arith.addf %100, %103 : vector<8x1xf32>
    %106 = arith.addf %104, %105 : vector<8x1xf32>
    %c0_55 = arith.constant 0 : index
    %107 = memref.load %arg8[%c0_55] : memref<4xf32, #tpu.memory_space<smem>>
    %108 = vector.broadcast %107 : f32 to vector<8x1xf32>
    %109 = arith.addf %106, %108 : vector<8x1xf32>
    %c1_56 = arith.constant 1 : index
    %c0_57 = arith.constant 0 : index
    %110 = memref.load %arg7[%c1_56, %c0_57] : memref<4x4xf32, #tpu.memory_space<smem>>
    %111 = vector.broadcast %110 : f32 to vector<8x1xf32>
    %112 = arith.mulf %85, %111 : vector<8x1xf32>
    %c1_58 = arith.constant 1 : index
    %c1_59 = arith.constant 1 : index
    %113 = memref.load %arg7[%c1_58, %c1_59] : memref<4x4xf32, #tpu.memory_space<smem>>
    %114 = vector.broadcast %113 : f32 to vector<8x1xf32>
    %115 = arith.mulf %87, %114 : vector<8x1xf32>
    %c1_60 = arith.constant 1 : index
    %c2_61 = arith.constant 2 : index
    %116 = memref.load %arg7[%c1_60, %c2_61] : memref<4x4xf32, #tpu.memory_space<smem>>
    %117 = vector.broadcast %116 : f32 to vector<8x1xf32>
    %118 = arith.mulf %89, %117 : vector<8x1xf32>
    %c1_62 = arith.constant 1 : index
    %c3_63 = arith.constant 3 : index
    %119 = memref.load %arg7[%c1_62, %c3_63] : memref<4x4xf32, #tpu.memory_space<smem>>
    %120 = vector.broadcast %119 : f32 to vector<8x1xf32>
    %121 = arith.mulf %91, %120 : vector<8x1xf32>
    %122 = arith.addf %112, %115 : vector<8x1xf32>
    %123 = arith.addf %118, %121 : vector<8x1xf32>
    %124 = arith.addf %122, %123 : vector<8x1xf32>
    %c1_64 = arith.constant 1 : index
    %125 = memref.load %arg8[%c1_64] : memref<4xf32, #tpu.memory_space<smem>>
    %126 = vector.broadcast %125 : f32 to vector<8x1xf32>
    %127 = arith.addf %124, %126 : vector<8x1xf32>
    %c2_65 = arith.constant 2 : index
    %c0_66 = arith.constant 0 : index
    %128 = memref.load %arg7[%c2_65, %c0_66] : memref<4x4xf32, #tpu.memory_space<smem>>
    %129 = vector.broadcast %128 : f32 to vector<8x1xf32>
    %130 = arith.mulf %85, %129 : vector<8x1xf32>
    %c2_67 = arith.constant 2 : index
    %c1_68 = arith.constant 1 : index
    %131 = memref.load %arg7[%c2_67, %c1_68] : memref<4x4xf32, #tpu.memory_space<smem>>
    %132 = vector.broadcast %131 : f32 to vector<8x1xf32>
    %133 = arith.mulf %87, %132 : vector<8x1xf32>
    %c2_69 = arith.constant 2 : index
    %c2_70 = arith.constant 2 : index
    %134 = memref.load %arg7[%c2_69, %c2_70] : memref<4x4xf32, #tpu.memory_space<smem>>
    %135 = vector.broadcast %134 : f32 to vector<8x1xf32>
    %136 = arith.mulf %89, %135 : vector<8x1xf32>
    %c2_71 = arith.constant 2 : index
    %c3_72 = arith.constant 3 : index
    %137 = memref.load %arg7[%c2_71, %c3_72] : memref<4x4xf32, #tpu.memory_space<smem>>
    %138 = vector.broadcast %137 : f32 to vector<8x1xf32>
    %139 = arith.mulf %91, %138 : vector<8x1xf32>
    %140 = arith.addf %130, %133 : vector<8x1xf32>
    %141 = arith.addf %136, %139 : vector<8x1xf32>
    %142 = arith.addf %140, %141 : vector<8x1xf32>
    %c2_73 = arith.constant 2 : index
    %143 = memref.load %arg8[%c2_73] : memref<4xf32, #tpu.memory_space<smem>>
    %144 = vector.broadcast %143 : f32 to vector<8x1xf32>
    %145 = arith.addf %142, %144 : vector<8x1xf32>
    %c3_74 = arith.constant 3 : index
    %c0_75 = arith.constant 0 : index
    %146 = memref.load %arg7[%c3_74, %c0_75] : memref<4x4xf32, #tpu.memory_space<smem>>
    %147 = vector.broadcast %146 : f32 to vector<8x1xf32>
    %148 = arith.mulf %85, %147 : vector<8x1xf32>
    %c3_76 = arith.constant 3 : index
    %c1_77 = arith.constant 1 : index
    %149 = memref.load %arg7[%c3_76, %c1_77] : memref<4x4xf32, #tpu.memory_space<smem>>
    %150 = vector.broadcast %149 : f32 to vector<8x1xf32>
    %151 = arith.mulf %87, %150 : vector<8x1xf32>
    %c3_78 = arith.constant 3 : index
    %c2_79 = arith.constant 2 : index
    %152 = memref.load %arg7[%c3_78, %c2_79] : memref<4x4xf32, #tpu.memory_space<smem>>
    %153 = vector.broadcast %152 : f32 to vector<8x1xf32>
    %154 = arith.mulf %89, %153 : vector<8x1xf32>
    %c3_80 = arith.constant 3 : index
    %c3_81 = arith.constant 3 : index
    %155 = memref.load %arg7[%c3_80, %c3_81] : memref<4x4xf32, #tpu.memory_space<smem>>
    %156 = vector.broadcast %155 : f32 to vector<8x1xf32>
    %157 = arith.mulf %91, %156 : vector<8x1xf32>
    %158 = arith.addf %148, %151 : vector<8x1xf32>
    %159 = arith.addf %154, %157 : vector<8x1xf32>
    %160 = arith.addf %158, %159 : vector<8x1xf32>
    %c3_82 = arith.constant 3 : index
    %161 = memref.load %arg8[%c3_82] : memref<4xf32, #tpu.memory_space<smem>>
    %162 = vector.broadcast %161 : f32 to vector<8x1xf32>
    %163 = arith.addf %160, %162 : vector<8x1xf32>
    %164 = arith.negf %109 : vector<8x1xf32>
    %165 = math.exp %164 : vector<8x1xf32>
    %cst_83 = arith.constant 1.000000e+00 : f32
    %166 = vector.broadcast %cst_83 : f32 to vector<8x1xf32>
    %167 = arith.addf %166, %165 : vector<8x1xf32>
    %168 = arith.divf %166, %167 : vector<8x1xf32>
    %169 = arith.negf %127 : vector<8x1xf32>
    %170 = math.exp %169 : vector<8x1xf32>
    %cst_84 = arith.constant 1.000000e+00 : f32
    %171 = vector.broadcast %cst_84 : f32 to vector<8x1xf32>
    %172 = arith.addf %171, %170 : vector<8x1xf32>
    %173 = arith.divf %171, %172 : vector<8x1xf32>
    %174 = arith.negf %145 : vector<8x1xf32>
    %175 = math.exp %174 : vector<8x1xf32>
    %cst_85 = arith.constant 1.000000e+00 : f32
    %176 = vector.broadcast %cst_85 : f32 to vector<8x1xf32>
    %177 = arith.addf %176, %175 : vector<8x1xf32>
    %178 = arith.divf %176, %177 : vector<8x1xf32>
    %179 = arith.negf %163 : vector<8x1xf32>
    %180 = math.exp %179 : vector<8x1xf32>
    %cst_86 = arith.constant 1.000000e+00 : f32
    %181 = vector.broadcast %cst_86 : f32 to vector<8x1xf32>
    %182 = arith.addf %181, %180 : vector<8x1xf32>
    %183 = arith.divf %181, %182 : vector<8x1xf32>
    %c0_87 = arith.constant 0 : index
    %c0_88 = arith.constant 0 : index
    %184 = vector.load %arg1[%c0_87, %c0_88] : memref<8x256xf32, #tpu.memory_space<vmem>>, vector<8x256xf32>
    %185 = vector.broadcast %168 : vector<8x1xf32> to vector<8x256xf32>
    %186 = arith.mulf %185, %184 : vector<8x256xf32>
    %c0_89 = arith.constant 0 : index
    %c0_90 = arith.constant 0 : index
    %187 = vector.load %arg2[%c0_89, %c0_90] : memref<8x256xf32, #tpu.memory_space<vmem>>, vector<8x256xf32>
    %188 = vector.broadcast %173 : vector<8x1xf32> to vector<8x256xf32>
    %189 = arith.mulf %188, %187 : vector<8x256xf32>
    %c0_91 = arith.constant 0 : index
    %c0_92 = arith.constant 0 : index
    %190 = vector.load %arg3[%c0_91, %c0_92] : memref<8x256xf32, #tpu.memory_space<vmem>>, vector<8x256xf32>
    %191 = vector.broadcast %178 : vector<8x1xf32> to vector<8x256xf32>
    %192 = arith.mulf %191, %190 : vector<8x256xf32>
    %c0_93 = arith.constant 0 : index
    %c0_94 = arith.constant 0 : index
    %193 = vector.load %arg4[%c0_93, %c0_94] : memref<8x256xf32, #tpu.memory_space<vmem>>, vector<8x256xf32>
    %194 = vector.broadcast %183 : vector<8x1xf32> to vector<8x256xf32>
    %195 = arith.mulf %194, %193 : vector<8x256xf32>
    %196 = arith.addf %186, %189 : vector<8x256xf32>
    %197 = arith.addf %192, %195 : vector<8x256xf32>
    %198 = arith.addf %196, %197 : vector<8x256xf32>
    %cst_95 = arith.constant 2.500000e-01 : f32
    %199 = vector.broadcast %cst_95 : f32 to vector<8x256xf32>
    %200 = arith.mulf %198, %199 : vector<8x256xf32>
    %c0_96 = arith.constant 0 : index
    %c0_97 = arith.constant 0 : index
    %201 = vector.load %arg9[%c0_96, %c0_97] : memref<8x256xf32, #tpu.memory_space<vmem>>, vector<8x256xf32>
    tpu.vector_store %arg9[%c0_96, %c0_97], %200 {strides = array<i32>} : memref<8x256xf32, #tpu.memory_space<vmem>>, vector<8x256xf32>,
    return
  }
  func.func @transform_0(%arg0: i32) -> (i32, i32) {
    %c0_i32 = arith.constant 0 : i32
    %c0_i32_0 = arith.constant 0 : i32
    return %arg0, %c0_i32 : i32, i32
  }
  func.func @transform_1(%arg0: i32) -> (i32, i32) {
    %c0_i32 = arith.constant 0 : i32
    %c0_i32_0 = arith.constant 0 : i32
    return %arg0, %c0_i32 : i32, i32
  }
  func.func @transform_2(%arg0: i32) -> (i32, i32) {
    %c0_i32 = arith.constant 0 : i32
    %c0_i32_0 = arith.constant 0 : i32
    return %arg0, %c0_i32 : i32, i32
  }
  func.func @transform_3(%arg0: i32) -> (i32, i32) {
    %c0_i32 = arith.constant 0 : i32
    %c0_i32_0 = arith.constant 0 : i32
    return %arg0, %c0_i32 : i32, i32
  }
  func.func @transform_4(%arg0: i32) -> (i32, i32) {
    %c0_i32 = arith.constant 0 : i32
    %c0_i32_0 = arith.constant 0 : i32
    %c0_i32_1 = arith.constant 0 : i32
    return %c0_i32, %c0_i32_0 : i32, i32
  }
  func.func @transform_5(%arg0: i32) -> i32 {
    %c0_i32 = arith.constant 0 : i32
    %c0_i32_0 = arith.constant 0 : i32
    return %c0_i32 : i32
  }
  func.func @transform_6(%arg0: i32) -> (i32, i32) {
    %c0_i32 = arith.constant 0 : i32
    %c0_i32_0 = arith.constant 0 : i32
    %c0_i32_1 = arith.constant 0 : i32
    return %c0_i32, %c0_i32_0 : i32, i32
  }
  func.func @transform_7(%arg0: i32) -> i32 {
    %c0_i32 = arith.constant 0 : i32
    %c0_i32_0 = arith.constant 0 : i32
    return %c0_i32 : i32
  }
  func.func @transform_8(%arg0: i32) -> (i32, i32) {
    %c0_i32 = arith.constant 0 : i32
    %c0_i32_0 = arith.constant 0 : i32
    return %arg0, %c0_i32 : i32, i32
  }
}

</mosaic_0001>

<bundles_post_ra>
// kernel: tpu_custom_call.1
= control target key start
LH: loop header
LB: loop body
LE: loop exit
PB: predicated region body
PF: predicated region fallthrough
CT: control target
= control target key end

     0   :  { %s1895_s0 = inlined_call_operand.hbm [shape: f32[16,256], index: 0, kind: input, shape index: {}]   ;;  %s1896_s1 = inlined_call_operand.hbm [shape: f32[16,256], index: 1, kind: input, shape index: {}]   ;;  %s1897_s2 = inlined_call_operand.hbm [shape: f32[16,256], index: 2, kind: input, shape index: {}]   ;;  %s1898_s3 = inlined_call_operand.hbm [shape: f32[16,256], index: 3, kind: input, shape index: {}]   ;;  %s1899_s4 = inlined_call_operand.hbm [shape: f32[4,4], index: 4, kind: input, shape index: {}]   ;;  %s1900_s5 = inlined_call_operand.vmem [shape: f32[4], index: 5, kind: input, shape index: {}]   ;;  %s1901_s6 = inlined_call_operand.vmem [shape: f32[4,4], index: 6, kind: input, shape index: {}]   ;;  %s1902_s7 = inlined_call_operand.vmem [shape: f32[4], index: 7, kind: input, shape index: {}]   ;;  %s1903_s8 = inlined_call_operand.hbm [shape: f32[16,256], index: 8, kind: output, shape index: {}]  }
   0x1   :  { %1916 = sst [smem:[#allocation34_spill]] %s1895_s0 }
   0x2   :  { %1917 = sst [smem:[#allocation35_spill]] %s1896_s1 }
   0x3   :  { %1918 = sst [smem:[#allocation36_spill]] %s1897_s2 }
   0x4   :  { %1919 = sst [smem:[#allocation37_spill]] %s1898_s3 }
   0x5   :  { %1920 = sst [smem:[#allocation38_spill]] %s1899_s4 }
   0x6   :  { %1921 = sst [smem:[#allocation39_spill]] %s1900_s5 }
   0x7   :  { %1922 = sst [smem:[#allocation40_spill]] %s1901_s6 }
   0x8   :  { %1923 = sst [smem:[#allocation41_spill]] %s1902_s7 }
   0x9   :  { %1924 = sst [smem:[#allocation42_spill]] %s1903_s8 }
   0xa   :  { %13 = vsyncpa [#allocation3], 0 }
   0xb   :  { %15 = vsyncpa [#allocation3 + $0x1], 0 }
   0xc   :  { %16 = vsyncpa [#allocation8], 0 }
   0xd   :  { %18 = vsyncpa [#allocation8 + $0x1], 0 }
   0xe   :  { %19 = vsyncpa [#allocation11], 0 }
   0xf   :  { %21 = vsyncpa [#allocation11 + $0x1], 0 }
  0x10   :  { %22 = vsyncpa [#allocation5], 0 }
  0x11   :  { %23 = vsyncpa [#allocation6], 0 }
  0x12   :  { %24 = vsyncpa [#allocation15], 0 }
  0x13   :  { %25 = vsyncpa [#allocation4], 0 }
  0x14   :  { %27 = vsyncpa [#allocation4 + $0x1], 0  ;;  %s1465_s27 = smov 0   ;;  %s1467_s28 = smov 0  }
  0x15   :  { %s1469_s29 = smov 0   ;;  %s1471_s30 = smov 0  }
  0x16 LB: > { %1925 = sst [smem:[#allocation25_spill]] %s1402_s27  ;;  %s1486_s9 = sadd.s32 4294967295, %s1414_s30   ;;  %s1414_s30 = sphi %s1471_s30, %s1967_s30   ;;  %s1410_s29 = sphi %s1469_s29, %s1970_s29   ;;  %s1406_s28 = sphi %s1467_s28, %s1969_s28   ;;  %s1402_s27 = sphi %s1465_s27, %s1968_s27  }
  0x17   : > { %1926 = sst [smem:[#allocation26_spill]] %s1406_s28  ;;  %s951_s10 = sadd.s32 4294967294, %s1414_s30  }
  0x18   : > { %1927 = sst [smem:[#allocation27_spill]] %s1410_s29  ;;  %p53_p0 = scmp.ne.s32.totalorder %s1406_s28, %s1402_s27 }
  0x19   : > { %1928 = sst [smem:[#allocation28_spill]] %s1414_s30  ;;  %p1912_p1 = scmp.eq.s32.totalorder %s1486_s9, 0 }
  0x1a   : > { %p239_p2 = scmp.eq.s32.totalorder %s1486_s9, 1  ;;  %p245_p3 = scmp.eq.s32.totalorder %s951_s10, 1 }
  0x1b   : > { %p1495_p4 = por %p1912_p1, %p53_p0  ;;  %p952_p5 = scmp.ge.s32.totalorder %s1414_s30, 1 }
  0x1c   : > { %p1500_p6 = por %p245_p3, %p53_p0  ;;  %p252_p7 = scmp.lt.s32.totalorder %s1414_s30, 3 }
  0x1d   : > { %s1932_s6 = sld [smem:[#allocation40_spill]]  ;;  %s1516_s17 = sadd.s32 1, %s1414_s30  }
  0x1e   : > { %s1930_s12 = scalar_select %p1500_p6, 1, 0 }
  0x1f   : > { %p1508_p8 = pnand %p952_p5, %p252_p7  ;;  %1934 = sst [smem:[#allocation30_spill]] %s1516_s17 }
  0x20   : > { %1931 = sst [smem:[#allocation29_spill]] %s1930_s12  ;;  %s37_s19 = ssub.s32 %s1414_s30, %s1516_s17 }
  0x21   : > { %p1056_p10 = pneg %p1508_p8  ;;  %p38_p12 = scmp.eq.s32.totalorder %s37_s19, 0 }
  0x22   : > { %s40_s20 = sadd.s32 1, %s1410_s29  ;;  %p47_p13 = scmp.ne.s32.totalorder %s1410_s29, %s1406_s28 }
  0x23   : > { %s284_s15 = sshll.u32 %s1932_s6, 4  ;;  %p1520_p11 = pnand %p1056_p10, %p1912_p1  ;;  %s285_s15 = int_to_ptr.vmem [resolvable:$true] %s284_s15 }
  0x24   : > { %s1416_s21 = smov [#allocation14]   ;;  %p48_p0 = scmp.eq.s32.totalorder %s1414_s30, 0 }
  0x25   : > { %1065 = dma.vmem_to_smem (!%p1520_p11), %s285_s15, 64, %s1416_s21, [#allocation15]  }
  0x26   : > { %s1532_s22 = scalar_select %p38_p12, %s1410_s29, %s40_s20  }
  0x27   : > { %p1537_p3 = por %p239_p2, %p47_p13  ;;  %p1090_p5 = scmp.lt.s32.totalorder %s1414_s30, 2 }
  0x28   : > { %1936 = sst [smem:[#allocation31_spill]] %s1532_s22  ;;  %s1543_s24 = sand.u32 1, %s1410_s29  }
  0x29   : > { %s1937_s23 = scalar_select %p1537_p3, 1, 0 }
  0x2a   : > { %p49_p7 = por %p48_p0, %p47_p13  ;;  %s1546_s25 = sshll.u32 %s1543_s24, 4 }
  0x2b   : > { %1938 = sst [smem:[#allocation32_spill]] %s1937_s23  ;;  %s1549_s26 = sshll.u32 %s1414_s30, 4 }
  0x2c   : > { %s325_s10 = sand.u32 1, %s1414_s30   ;;  %p1552_p10 = pnand %p1090_p5, %p49_p7 }
  0x2d   : > { %s1940_s1 = sld [smem:[#allocation35_spill]]  ;;  %s329_s21 = scalar_lea.vmem [#allocation7], %s1546_s25 }
  0x2e   : > { %s338_s6 = sshll.u32 %s329_s21, 4  ;;  %s1941_s4 = sld [smem:[#allocation38_spill]]  ;;  %s339_s6 = int_to_ptr.vmem [resolvable:$true] %s338_s6 }
  0x2f   : > { %s1564_s30 = scalar_lea.sflag [#allocation8], %s325_s10  ;;  %p1167_p12 = pneg %p1552_p10 }
  0x33   : > { %s334_s19 = scalar_lea.hbm %s1940_s1, %s1549_s26 }
  0x34   : > { %s336_s20 = sshll.u32 %s334_s19, 4  ;;  %s264_s17 = sshll.u32 %s1941_s4, 4  ;;  %s337_s20 = int_to_ptr.hbm [resolvable:$true] %s336_s20  ;;  %s265_s17 = int_to_ptr.hbm [resolvable:$true] %s264_s17 }
  0x35   : > { %s1163_s12 = sshra.s32 %s337_s20, 4  ;;  %s1170_s19 = scalar_lea.hbm %s1940_s1, 32  ;;  %s1164_s12 = int_to_ptr.hbm [resolvable:$true] %s1163_s12 }
  0x36   : > { %s1165_s27 = scalar_lea.hbm %s1164_s12, 16  ;;  %p1171_p5 = scmp.lt.s32.totalorder %s1164_s12, %s1940_s1 }
  0x37   : > { %p1166_p2 = scmp.ne.s32.totalorder %s1164_s12, %s1165_s27  ;;  %p1172_p7 = scmp.lt.s32.totalorder %s1170_s19, %s1165_s27 }
  0x39   : > { %p1168_p13 = pnand %p1167_p12, %p1166_p2  ;;  %p1173_p9 = por %p1172_p7, %p1171_p5 }
  0x3b   : > { %p1169_p0 = pneg %p1168_p13 }
  0x3d   : > { %p1174_p1 = pnand %p1173_p9, %p1169_p0 }
  0x3f   : > { %1177 = shalt.err (!%p1174_p1)
}
  0x40   : > { %1075 = dma.hbm_to_vmem [thread:$0]  (!%p1552_p10), %s337_s20, 256, %s339_s6, %s1564_s30  }
  0x41   : > { %s1417_s29 = smov [#allocation12]   ;;  %s1942_s5 = sld [smem:[#allocation39_spill]] }
  0x42   : > { %1059 = dma.hbm_to_smem (!%p1520_p11), %s265_s17, 64, %s1417_s29, [#allocation5]  }
  0x43   : > { %s1943_s7 = sld [smem:[#allocation41_spill]]  ;;  %s1418_s15 = smov [#allocation13]  }
  0x44   : > { %s1419_s6 = smov [#allocation16]   ;;  %s1944_s0 = sld [smem:[#allocation34_spill]] }
  0x45   : > { %s309_s21 = scalar_lea.vmem [#allocation2], %s1546_s25  ;;  %s306_s12 = scalar_lea.sflag [#allocation3], %s1543_s24 }
  0x46   : > { %s318_s29 = sshll.u32 %s309_s21, 4  ;;  %s319_s29 = int_to_ptr.vmem [resolvable:$true] %s318_s29 }
  0x47   : > { %s274_s27 = sshll.u32 %s1942_s5, 4  ;;  %s275_s27 = int_to_ptr.vmem [resolvable:$true] %s274_s27 }
  0x48   : > { %1062 = dma.vmem_to_smem (!%p1520_p11), %s275_s27, 16, %s1418_s15, [#allocation6]  }
  0x49   : > { %s294_s14 = sshll.u32 %s1943_s7, 4  ;;  %s295_s14 = int_to_ptr.vmem [resolvable:$true] %s294_s14 }
  0x4a   : > { %1068 = dma.vmem_to_smem (!%p1520_p11), %s295_s14, 16, %s1419_s6, [#allocation15]  }
  0x4b   : > { %s314_s17 = scalar_lea.hbm %s1944_s0, %s1549_s26  ;;  %s1245_s14 = scalar_lea.hbm %s1944_s0, 32 }
  0x4c   : > { %s316_s22 = sshll.u32 %s314_s17, 4  ;;  %s317_s22 = int_to_ptr.hbm [resolvable:$true] %s316_s22 }
  0x4d   : > { %s1238_s23 = sshra.s32 %s317_s22, 4  ;;  %s1239_s23 = int_to_ptr.hbm [resolvable:$true] %s1238_s23 }
  0x4e   : > { %s1240_s10 = scalar_lea.hbm %s1239_s23, 16  ;;  %p1246_p11 = scmp.lt.s32.totalorder %s1239_s23, %s1944_s0 }
  0x4f   : > { %p1241_p1 = scmp.ne.s32.totalorder %s1239_s23, %s1240_s10  ;;  %p1247_p13 = scmp.lt.s32.totalorder %s1245_s14, %s1240_s10 }
  0x51   : > { %p1243_p9 = pnand %p1241_p1, %p1167_p12  ;;  %p1248_p0 = por %p1247_p13, %p1246_p11 }
  0x53   : > { %p1244_p2 = pneg %p1243_p9 }
  0x55   : > { %p1249_p5 = pnand %p1248_p0, %p1244_p2 }
  0x57   : > { %1252 = shalt.err (!%p1249_p5)
}
  0x58   : > { %1072 = dma.hbm_to_vmem [thread:$0]  (!%p1552_p10), %s317_s22, 256, %s319_s29, %s306_s12  }
  0x59   : > { %s1945_s2 = sld [smem:[#allocation36_spill]]  ;;  %s349_s21 = scalar_lea.vmem [#allocation9], %s1546_s25 }
  0x5a   : > { %s358_s18 = sshll.u32 %s349_s21, 4  ;;  %s359_s18 = int_to_ptr.vmem [resolvable:$true] %s358_s18 }
  0x5f   : > { %s354_s17 = scalar_lea.hbm %s1945_s2, %s1549_s26  ;;  %s1275_s29 = scalar_lea.hbm %s1945_s2, 32 }
  0x60   : > { %s356_s27 = sshll.u32 %s354_s17, 4  ;;  %s357_s27 = int_to_ptr.hbm [resolvable:$true] %s356_s27 }
  0x61   : > { %s1268_s23 = sshra.s32 %s357_s27, 4  ;;  %s1269_s23 = int_to_ptr.hbm [resolvable:$true] %s1268_s23 }
  0x62   : > { %s1270_s10 = scalar_lea.hbm %s1269_s23, 16  ;;  %p1276_p2 = scmp.lt.s32.totalorder %s1269_s23, %s1945_s2 }
  0x63   : > { %p1271_p7 = scmp.ne.s32.totalorder %s1269_s23, %s1270_s10  ;;  %p1277_p11 = scmp.lt.s32.totalorder %s1275_s29, %s1270_s10 }
  0x65   : > { %p1273_p1 = pnand %p1271_p7, %p1167_p12  ;;  %p1278_p13 = por %p1277_p11, %p1276_p2 }
  0x67   : > { %p1274_p9 = pneg %p1273_p1 }
  0x69   : > { %p1279_p0 = pnand %p1278_p13, %p1274_p9 }
  0x6b   : > { %1282 = shalt.err (!%p1279_p0)
}
  0x6c   : > { %1078 = dma.hbm_to_vmem [thread:$0]  (!%p1552_p10), %s357_s27, 256, %s359_s18, %s1564_s30  }
  0x6d   : > { %s1946_s3 = sld [smem:[#allocation37_spill]]  ;;  %s369_s21 = scalar_lea.vmem [#allocation10], %s1546_s25 }
  0x6e   : > { %s378_s14 = sshll.u32 %s369_s21, 4  ;;  %s366_s23 = scalar_lea.sflag [#allocation11], %s1543_s24  ;;  %s379_s14 = int_to_ptr.vmem [resolvable:$true] %s378_s14 }
  0x73   : > { %s374_s19 = scalar_lea.hbm %s1946_s3, %s1549_s26  ;;  %s1305_s18 = scalar_lea.hbm %s1946_s3, 32 }
  0x74   : > { %s376_s17 = sshll.u32 %s374_s19, 4  ;;  %s377_s17 = int_to_ptr.hbm [resolvable:$true] %s376_s17 }
  0x75   : > { %s1298_s10 = sshra.s32 %s377_s17, 4  ;;  %s1299_s10 = int_to_ptr.hbm [resolvable:$true] %s1298_s10 }
  0x76   : > { %s1300_s15 = scalar_lea.hbm %s1299_s10, 16  ;;  %p1306_p9 = scmp.lt.s32.totalorder %s1299_s10, %s1946_s3 }
  0x77   : > { %p1301_p5 = scmp.ne.s32.totalorder %s1299_s10, %s1300_s15  ;;  %p1307_p2 = scmp.lt.s32.totalorder %s1305_s18, %s1300_s15 }
  0x79   : > { %p1303_p7 = pnand %p1301_p5, %p1167_p12  ;;  %p1308_p11 = por %p1307_p2, %p1306_p9 }
  0x7b   : > { %p1304_p1 = pneg %p1303_p7 }
  0x7d   : > { %p1309_p13 = pnand %p1308_p11, %p1304_p1 }
  0x7f   : > { %1312 = shalt.err (!%p1309_p13)
}
  0x80   : > { %1081 = dma.hbm_to_vmem [thread:$0]  (!%p1552_p10), %s377_s17, 256, %s379_s14, %s366_s23  }
  0x81   : > { %387 = sbr.rel (%p1508_p8) target bundleno = 347 (0x15b), region = 52 }
  0x86   : > { %s1646_s24 = sand.u32 1, %s1406_s28  }
  0x87   : > { %1947 = sst [smem:[#allocation33_spill]] %s1646_s24  ;;  %s1649_s25 = sshll.u32 %s1646_s24, 4 }
  0x88   : > { %s390_s22 = scalar_lea.sflag [#allocation3], %s1646_s24  ;;  %s393_s12 = scalar_lea.vmem [#allocation2], %s1649_s25 }
  0x89   : > { %1373 = dma.done.wait (%p1495_p4), %s390_s22, 256  }
  0x8a   : > { %1375 = vsyncadd (%p1495_p4), %s390_s22, 4294967040  ;;  %s399_s16 = sand.u32 1, %s1486_s9   ;;  %s403_s6 = scalar_lea.vmem [#allocation7], %s1649_s25 }
  0x8b   : > { %s400_s13 = scalar_lea.sflag [#allocation8], %s399_s16 }
  0x8c   : > { %1377 = dma.done.wait (%p1495_p4), %s400_s13, 512  }
  0x8d   : > { %1379 = vsyncadd (%p1495_p4), %s400_s13, 4294966784  ;;  %s413_s20 = scalar_lea.vmem [#allocation9], %s1649_s25  ;;  %s420_s19 = scalar_lea.sflag [#allocation11], %s1646_s24 }
  0x8e   : > { %s423_s17 = scalar_lea.vmem [#allocation10], %s1649_s25 }
  0x8f   : > { %1381 = dma.done.wait (%p1495_p4), %s420_s19, 256  }
  0x90   : > { %1383 = vsyncadd (%p1495_p4), %s420_s19, 4294967040  ;;  %p1948_p8 = scmp.eq.s32.totalorder %s1486_s9, 0 }
  0x92   : > { %1385 = dma.done.wait (%p1948_p8), [#allocation5], 64   ;;  %p1949_p10 = pmov %p1948_p8 }
  0x93   : > { %p1950_p12 = pmov %p1948_p8 }
  0x94   : > { %1387 = vsyncadd (%p1949_p10), [#allocation5], 4294967232 }
  0x95   : > { %1389 = dma.done.wait (%p1950_p12), [#allocation6], 16   ;;  %p1951_p0 = pmov %p1948_p8 }
  0x97   : > { %1391 = vsyncadd (%p1951_p0), [#allocation6], 4294967280  ;;  %p1952_p5 = pmov %p1951_p0 }
  0x98   : > { %p1953_p7 = pmov %p1951_p0 }
  0x99   : > { %1393 = dma.done.wait (%p1952_p5), [#allocation15], 80  }
  0x9a   : > { %1395 = vsyncadd (%p1953_p7), [#allocation15], 4294967216 }
  0x9b   : > { %449 = sfence }
  0x9c   : > { %v1682_v0 = vld [vmem:[%s413_s20] sm:$0xff]  ;;  %v1684_v1 = vld [vmem:[%s413_s20 + $0x8] sm:$0xff]  ;;  %s1706_s11 = sld [smem:[#allocation12 + $0x2]] }
  0x9d   : > { %v1686_v2 = vld [vmem:[%s393_s12] sm:$0xff]  ;;  %v505_v3 = vmax.f32 %v1682_v0, %v1684_v1  ;;  %v1690_v4 = vld [vmem:[%s393_s12 + $0x8] sm:$0xff]  ;;  %s1708_s21 = sld [smem:[#allocation12 + $0x82]] }
  0x9e   : > { %v495_v5 = vmax.f32 %v1686_v2, %v1690_v4  ;;  %v1694_v6 = vld [vmem:[%s423_s17] sm:$0xff]  ;;  %v1696_v7 = vld [vmem:[%s423_s17 + $0x8] sm:$0xff]  ;;  %s1710_s14 = sld [smem:[#allocation12 + $0x102]] }
  0x9f   : > { %506 = vmax.xlane.f32.xlu1 %v505_v3  ;;  %v1698_v8 = vld [vmem:[%s403_s6] sm:$0xff]  ;;  %v1700_v9 = vld [vmem:[%s403_s6 + $0x8] sm:$0xff]  ;;  %v510_v10 = vmax.f32 %v1694_v6, %v1696_v7  ;;  %s1712_s23 = sld [smem:[#allocation12 + $0x182]] }
  0xa0   : > { %496 = vmax.xlane.f32.xlu0 %v495_v5  ;;  %v500_v11 = vmax.f32 %v1698_v8, %v1700_v9  ;;  %s1714_s10 = sld [smem:[#allocation12]] }
  0xa1   : > { %s1716_s15 = sld [smem:[#allocation12 + $0x80]] }
  0xa2   : > { %s1718_s29 = sld [smem:[#allocation12 + $0x100]]  ;;  %v520_v13 = vstv %s1706_s11 }
  0xa3   : > { %s1720_s30 = sld [smem:[#allocation12 + $0x180]]  ;;  %v538_v14 = vstv %s1708_s21 }
  0xa4   : > { %s1722_s18 = sld [smem:[#allocation12 + $0x3]]  ;;  %v556_v16 = vstv %s1710_s14 }
  0xa5   : > { %s1724_s27 = sld [smem:[#allocation12 + $0x83]]  ;;  %v574_v17 = vstv %s1712_s23 }
  0xa6   : > { %s1726_s26 = sld [smem:[#allocation12 + $0x103]]  ;;  %v514_v18 = vstv %s1714_s10 }
  0xa7   : > { %511 = vmax.xlane.f32.xlu1 %v510_v10  ;;  %s1728_s22 = sld [smem:[#allocation12 + $0x183]]  ;;  %v532_v19 = vstv %s1716_s15 }
  0xa8   : > { %501 = vmax.xlane.f32.xlu0 %v500_v11  ;;  %s1730_s12 = sld [smem:[#allocation12 + $0x1]]  ;;  %v550_v20 = vstv %s1718_s29 }
  0xa9   : > { %s1732_s16 = sld [smem:[#allocation13]]  ;;  %v568_v21 = vstv %s1720_s30 }
  0xaa   : > { %s1734_s13 = sld [smem:[#allocation12 + $0x81]]  ;;  %v523_v22 = vstv %s1722_s18  ;;  %s492_s18 = scalar_lea.vmem [#allocation17], %s1649_s25 }
  0xab   : > { %s1736_s6 = sld [smem:[#allocation13 + $0x1]]  ;;  %v541_v23 = vstv %s1724_s27  ;;  %s769_s27 = sshll.u32 %s492_s18, 4  ;;  %s770_s27 = int_to_ptr.vmem [resolvable:$true] %s769_s27 }
  0xac   : > { %s1738_s20 = sld [smem:[#allocation12 + $0x101]]  ;;  %v559_v24 = vstv %s1726_s26 }
  0xad   : > { %s1740_s19 = sld [smem:[#allocation13 + $0x2]]  ;;  %v577_v25 = vstv %s1728_s22 }
  0xae   : > { %s1742_s17 = sld [smem:[#allocation12 + $0x181]]  ;;  %v517_v26 = vstv %s1730_s12 }
  0xaf   : > { %s1744_s0 = sld [smem:[#allocation13 + $0x3]]  ;;  %v529_v28 = vstv %s1732_s16 }
  0xb0   : > { %s1746_s1 = sld [smem:[#allocation14]]  ;;  %v535_v27 = vstv %s1734_s13 }
  0xb1   : > { %s1748_s2 = sld [smem:[#allocation14 + $0x1]]  ;;  %v547_v29 = vstv %s1736_s6 }
  0xb2   : > { %s1750_s3 = sld [smem:[#allocation14 + $0x2]]  ;;  %v553_v30 = vstv %s1738_s20 }
  0xb3   : > { %s1752_s4 = sld [smem:[#allocation14 + $0x3]]  ;;  %v565_v32 = vstv %s1740_s19 }
  0xb4   : > { %s1754_s5 = sld [smem:[#allocation16]]  ;;  %v571_v31 = vstv %s1742_s17 }
  0xb5   : > { %s1756_s7 = sld [smem:[#allocation14 + $0x80]]  ;;  %v583_v33 = vstv %s1744_s0 }
  0xb6   : > { %s1758_s28 = sld [smem:[#allocation14 + $0x81]]  ;;  %v590_v34 = vstv %s1746_s1  ;;  %s1029_s1 = sshll.u32 %s1486_s9, 4 }
  0xb7   : > { %s1762_s8 = sld [smem:[#allocation14 + $0x82]]  ;;  %v593_v35 = vstv %s1748_s2 }
  0xb8   : > { %s1768_s24 = sld [smem:[#allocation14 + $0x83]]  ;;  %v596_v62 = vstv %s1750_s3 }
  0xb9   : > { %s1774_s11 = sld [smem:[#allocation16 + $0x1]]  ;;  %v599_v63 = vstv %s1752_s4 }
  0xba   : > { %s1780_s21 = sld [smem:[#allocation14 + $0x100]]  ;;  %v605_v3 = vstv %s1754_s5 }
  0xbb   : > { %s1786_s14 = sld [smem:[#allocation14 + $0x101]]  ;;  %v608_v5 = vstv %s1756_s7 }
  0xbc   : > { %s1792_s23 = sld [smem:[#allocation14 + $0x102]] }
  0xbd   : > { %s1794_s10 = sld [smem:[#allocation14 + $0x103]] }
  0xbe   : > { %s1796_s15 = sld [smem:[#allocation14 + $0x180]] }
  0xbf   : > { %s1798_s0 = sld [smem:[#allocation14 + $0x181]] }
  0xc0   : > { %s1800_s29 = sld [smem:[#allocation14 + $0x182]] }
  0xc1   : > { %s1802_s30 = sld [smem:[#allocation14 + $0x183]] }
  0xc2   : > { %s1816_s3 = sld [smem:[#allocation16 + $0x2]] }
  0xc3   : > { %s1822_s4 = sld [smem:[#allocation16 + $0x3]] }
  0xc4   : > { %s1960_s2 = sld [smem:[#allocation33_spill]] }
  0xca   : > { %s756_s26 = scalar_lea.sflag [#allocation4], %s1960_s2 }
 0x112   : > { %v507_v12 = vpop.xlane.xlu1 %506 }
 0x113   : > { %v497_v15 = vpop.xlane.xlu0 %496  ;;  %v521_v36 = vmul.f32 %v520_v13, %v507_v12  ;;  %v539_v37 = vmul.f32 %v538_v14, %v507_v12  ;;  %v557_v38 = vmul.f32 %v556_v16, %v507_v12  ;;  %v575_v39 = vmul.f32 %v574_v17, %v507_v12 }
 0x114   : > { %v515_v40 = vmul.f32 %v514_v18, %v497_v15  ;;  %v533_v41 = vmul.f32 %v532_v19, %v497_v15  ;;  %v551_v42 = vmul.f32 %v550_v20, %v497_v15  ;;  %v569_v43 = vmul.f32 %v568_v21, %v497_v15 }
 0x115   : > { %v611_v14 = vstv %s1758_s28  ;;  %v614_v15 = vstv %s1762_s8  ;;  %v617_v16 = vstv %s1768_s24  ;;  %v623_v17 = vstv %s1774_s11  ;;  %s1961_s8 = sld [smem:[#allocation42_spill]] }
 0x11a   : > { %v512_v44 = vpop.xlane.xlu1 %511 }
 0x11b   : > { %v524_v45 = vmul.f32 %v523_v22, %v512_v44  ;;  %v542_v46 = vmul.f32 %v541_v23, %v512_v44  ;;  %v560_v47 = vmul.f32 %v559_v24, %v512_v44  ;;  %v578_v48 = vmul.f32 %v577_v25, %v512_v44  ;;  %v502_v49 = vpop.xlane.xlu0 %501  ;;  %s767_s28 = scalar_lea.hbm %s1961_s8, %s1029_s1  ;;  %s1348_s25 = scalar_lea.hbm %s1961_s8, 32 }
 0x11c   : > { %v518_v50 = vmul.f32 %v517_v26, %v502_v49  ;;  %v536_v51 = vmul.f32 %v535_v27, %v502_v49  ;;  %v554_v52 = vmul.f32 %v553_v30, %v502_v49  ;;  %v572_v53 = vmul.f32 %v571_v31, %v502_v49  ;;  %s771_s9 = sshll.u32 %s767_s28, 4  ;;  %s772_s9 = int_to_ptr.hbm [resolvable:$true] %s771_s9 }
 0x11d   : > { %v526_v54 = vadd.f32 %v524_v45, %v521_v36  ;;  %v544_v55 = vadd.f32 %v542_v46, %v539_v37  ;;  %v562_v56 = vadd.f32 %v560_v47, %v557_v38  ;;  %v580_v57 = vadd.f32 %v578_v48, %v575_v39  ;;  %s1342_s22 = sshra.s32 %s772_s9, 4  ;;  %s1343_s22 = int_to_ptr.hbm [resolvable:$true] %s1342_s22 }
 0x11e   : > { %v525_v58 = vadd.f32 %v518_v50, %v515_v40  ;;  %v543_v59 = vadd.f32 %v536_v51, %v533_v41  ;;  %v561_v60 = vadd.f32 %v554_v52, %v551_v42  ;;  %v579_v61 = vadd.f32 %v572_v53, %v569_v43  ;;  %s1344_s12 = scalar_lea.hbm %s1343_s22, 16  ;;  %p1349_p2 = scmp.lt.s32.totalorder %s1343_s22, %s1961_s8 }
 0x11f   : > { %v626_v22 = vstv %s1780_s21  ;;  %v629_v23 = vstv %s1786_s14  ;;  %v632_v24 = vstv %s1792_s23  ;;  %v635_v25 = vstv %s1794_s10  ;;  %p1345_p4 = scmp.ne.s32.totalorder %s1343_s22, %s1344_s12  ;;  %p1350_p11 = scmp.lt.s32.totalorder %s1348_s25, %s1344_s12 }
 0x120   : > { %v527_v10 = vadd.f32 %v526_v54, %v525_v58  ;;  %v545_v11 = vadd.f32 %v544_v55, %v543_v59  ;;  %v563_v12 = vadd.f32 %v562_v56, %v561_v60  ;;  %v581_v13 = vadd.f32 %v580_v57, %v579_v61 }
 0x121   : > { %v644_v36 = vstv %s1796_s15  ;;  %v647_v37 = vstv %s1798_s0  ;;  %v650_v38 = vstv %s1800_s29  ;;  %v641_v58 = vstv %s1816_s3  ;;  %p1346_p1 = pnand %p1345_p4, %p1537_p3  ;;  %p1351_p13 = por %p1350_p11, %p1349_p2 }
 0x122   : > { %v530_v18 = vadd.f32 %v529_v28, %v527_v10  ;;  %v548_v19 = vadd.f32 %v547_v29, %v545_v11  ;;  %v566_v20 = vadd.f32 %v565_v32, %v563_v12  ;;  %v584_v21 = vadd.f32 %v583_v33, %v581_v13 }
 0x123   : > { %v653_v28 = vstv %s1802_s30  ;;  %p1347_p9 = pneg %p1346_p1 }
 0x124   : > { %v585_v26 = vmax.f32 %v530_v18, 0.0  ;;  %v586_v27 = vmax.f32 %v548_v19, 0.0  ;;  %v587_v30 = vmax.f32 %v566_v20, 0.0  ;;  %v588_v31 = vmax.f32 %v584_v21, 0.0 }
 0x125   : > { %p1352_p8 = pnand %p1351_p13, %p1347_p9 }
 0x126   : > { %v591_v29 = vmul.f32 %v590_v34, %v585_v26  ;;  %v594_v32 = vmul.f32 %v593_v35, %v586_v27  ;;  %v597_v33 = vmul.f32 %v596_v62, %v587_v30  ;;  %v600_v39 = vmul.f32 %v599_v63, %v588_v31 }
 0x127   : > { %v609_v40 = vmul.f32 %v608_v5, %v585_v26  ;;  %v612_v41 = vmul.f32 %v611_v14, %v586_v27  ;;  %v615_v42 = vmul.f32 %v614_v15, %v587_v30  ;;  %v618_v43 = vmul.f32 %v617_v16, %v588_v31 }
 0x128   : > { %v601_v44 = vadd.f32 %v594_v32, %v591_v29  ;;  %v602_v45 = vadd.f32 %v600_v39, %v597_v33  ;;  %v627_v46 = vmul.f32 %v626_v22, %v585_v26  ;;  %v630_v47 = vmul.f32 %v629_v23, %v586_v27 }
 0x129   : > { %v619_v48 = vadd.f32 %v612_v41, %v609_v40  ;;  %v620_v49 = vadd.f32 %v618_v43, %v615_v42  ;;  %v633_v50 = vmul.f32 %v632_v24, %v587_v30  ;;  %v636_v51 = vmul.f32 %v635_v25, %v588_v31 }
 0x12a   : > { %v603_v52 = vadd.f32 %v602_v45, %v601_v44  ;;  %v637_v34 = vadd.f32 %v630_v47, %v627_v46  ;;  %v645_v53 = vmul.f32 %v644_v36, %v585_v26  ;;  %v648_v35 = vmul.f32 %v647_v37, %v586_v27 }
 0x12b   : > { %v621_v54 = vadd.f32 %v620_v49, %v619_v48  ;;  %v638_v55 = vadd.f32 %v636_v51, %v633_v50  ;;  %v651_v56 = vmul.f32 %v650_v38, %v587_v30  ;;  %v654_v57 = vmul.f32 %v653_v28, %v588_v31 }
 0x12c   : > { %v606_v59 = vadd.f32 %v605_v3, %v603_v52  ;;  %v655_v60 = vadd.f32 %v648_v35, %v645_v53  ;;  %v659_v5 = vstv %s1822_s4 }
 0x12d   : > { %v624_v61 = vadd.f32 %v623_v17, %v621_v54  ;;  %v639_v62 = vadd.f32 %v638_v55, %v637_v34  ;;  %v656_v63 = vadd.f32 %v654_v57, %v651_v56 }
 0x12e   : > { %v1016_v10 = vmul.f32 -1.442695, %v606_v59 }
 0x12f   : > { %v642_v11 = vadd.f32 %v641_v58, %v639_v62  ;;  %v657_v12 = vadd.f32 %v656_v63, %v655_v60  ;;  %v1017_v13 = vmul.f32 -1.442695, %v624_v61 }
 0x130   : > { %1132 = vpow2.f32 %v1016_v10 }
 0x131   : > { %v660_v14 = vadd.f32 %v659_v5, %v657_v12  ;;  %1134 = vpow2.f32 %v1017_v13  ;;  %v1018_v15 = vmul.f32 -1.442695, %v642_v11 }
 0x133   : > { %1136 = vpow2.f32 %v1018_v15  ;;  %v1019_v16 = vmul.f32 -1.442695, %v660_v14 }
 0x135   : > { %1138 = vpow2.f32 %v1019_v16 }
 0x136   : > { %v1133_v18 = vpop.eup %1132 }
 0x137   : > { %v1135_v19 = vpop.eup %1134  ;;  %v664_v20 = vadd.f32 1.0, %v1133_v18 }
 0x138   : > { %v683_v3 = vadd.f32 1.0, %v1135_v19 }
 0x139   : > { %v1137_v21 = vpop.eup %1136  ;;  %1140 = vrcp.f32 %v664_v20  ;;  %v674_v24 = vand.u32 2147483647, %v664_v20  ;;  %v676_v25 = vand.u32 2147483648, %v664_v20  ;;  %vm670_vm0 = vweird.f32 %v664_v20 }
 0x13a   : > { %1142 = vrcp.f32 %v683_v3  ;;  %v702_v17 = vadd.f32 1.0, %v1137_v21  ;;  %v693_v27 = vand.u32 2147483647, %v683_v3  ;;  %v695_v36 = vand.u32 2147483648, %v683_v3 }
 0x13b   : > { %v1139_v22 = vpop.eup %1138  ;;  %vm1830_vm1 = vcmp.eq.f32.partialorder %v674_v24, 8.507059e+37  ;;  %v677_v32 = vor.u32 1.1754944e-38, %v676_v25  ;;  %vm689_vm2 = vweird.f32 %v683_v3 }
 0x13c   : > { %1144 = vrcp.f32 %v702_v17  ;;  %v721_v23 = vadd.f32 1.0, %v1139_v22  ;;  %vm1834_vm3 = vcmp.eq.f32.partialorder %v693_v27, 8.507059e+37  ;;  %vm708_vm4 = vweird.f32 %v702_v17 }
 0x13d   : > { %v696_v43 = vor.u32 1.1754944e-38, %v695_v36  ;;  %v712_v44 = vand.u32 2147483647, %v702_v17  ;;  %v714_v49 = vand.u32 2147483648, %v702_v17 }
 0x13e   : > { %1146 = vrcp.f32 %v721_v23  ;;  %vm727_vm7 = vweird.f32 %v721_v23  ;;  %v731_v50 = vand.u32 2147483647, %v721_v23  ;;  %v733_v54 = vand.u32 2147483648, %v721_v23 }
 0x13f   : > { %v1141_v26 = vpop.eup %1140  ;;  %vm1840_vm11 = vcmp.eq.f32.partialorder %v712_v44, 8.507059e+37  ;;  %v715_v60 = vor.u32 1.1754944e-38, %v714_v49 }
 0x140   : > { %v1143_v30 = vpop.eup %1142  ;;  %v666_v31 = vmul.f32 %v1141_v26, %v664_v20  ;;  %vm671_vm5 = vweird.f32 %v1141_v26  ;;  %v734_v13 = vor.u32 1.1754944e-38, %v733_v54  ;;  %vm732_vm15 = vcmp.eq.f32.partialorder %v731_v50, 8.507059e+37 }
 0x141   : > { %v685_v37 = vmul.f32 %v1143_v30, %v683_v3  ;;  %vm690_vm6 = vweird.f32 %v1143_v30  ;;  %vm672_vm8 = vmor %vm670_vm0, %vm671_vm5 }
 0x142   : > { %v1145_v38 = vpop.eup %1144  ;;  %v667_v28 = vsub.f32 1.0, %v666_v31  ;;  %vm691_vm10 = vmor %vm689_vm2, %vm690_vm6 }
 0x143   : > { %v686_v33 = vsub.f32 1.0, %v685_v37  ;;  %v704_v40 = vmul.f32 %v1145_v38, %v702_v17  ;;  %vm709_vm9 = vweird.f32 %v1145_v38 }
 0x144   : > { %v1147_v41 = vpop.eup %1146  ;;  %v668_v42 = vmul.f32 %v1141_v26, %v667_v28  ;;  %vm710_vm13 = vmor %vm708_vm4, %vm709_vm9 }
 0x145   : > { %v687_v45 = vmul.f32 %v1143_v30, %v686_v33  ;;  %v705_v46 = vsub.f32 1.0, %v704_v40  ;;  %v723_v47 = vmul.f32 %v1147_v41, %v721_v23  ;;  %vm728_vm12 = vweird.f32 %v1147_v41 }
 0x146   : > { %v669_v48 = vadd.f32 %v1141_v26, %v668_v42  ;;  %vm729_vm14 = vmor %vm727_vm7, %vm728_vm12 }
 0x147   : > { %v688_v51 = vadd.f32 %v1143_v30, %v687_v45  ;;  %v706_v52 = vmul.f32 %v1145_v38, %v705_v46  ;;  %v724_v34 = vsub.f32 1.0, %v723_v47 }
 0x148   : > { %v673_v53 = vsel %vm672_vm8, %v1141_v26, %v669_v48 }
 0x149   : > { %v678_v55 = vsel %vm1830_vm1, %v677_v32, %v673_v53  ;;  %v692_v56 = vsel %vm691_vm10, %v1143_v30, %v688_v51  ;;  %v707_v57 = vadd.f32 %v1145_v38, %v706_v52  ;;  %v725_v58 = vmul.f32 %v1147_v41, %v724_v34 }
 0x14a   : > { %v697_v59 = vsel %vm1834_vm3, %v696_v43, %v692_v56  ;;  %v737_v61 = vmul.f32 %v678_v55, %v1686_v2  ;;  %v738_v62 = vmul.f32 %v678_v55, %v1690_v4 }
 0x14b   : > { %v711_v63 = vsel %vm710_vm13, %v1145_v38, %v707_v57  ;;  %v726_v5 = vadd.f32 %v1147_v41, %v725_v58  ;;  %v739_v10 = vmul.f32 %v697_v59, %v1698_v8  ;;  %v740_v11 = vmul.f32 %v697_v59, %v1700_v9 }
 0x14c   : > { %v716_v12 = vsel %vm1840_vm11, %v715_v60, %v711_v63 }
 0x14d   : > { %v730_v14 = vsel %vm729_vm14, %v1147_v41, %v726_v5  ;;  %v741_v2 = vmul.f32 %v716_v12, %v1682_v0  ;;  %v742_v4 = vmul.f32 %v716_v12, %v1684_v1  ;;  %v745_v16 = vadd.f32 %v739_v10, %v737_v61 }
 0x14e   : > { %v735_v15 = vsel %vm732_vm15, %v734_v13, %v730_v14  ;;  %v746_v18 = vadd.f32 %v740_v11, %v738_v62 }
 0x14f   : > { %v743_v8 = vmul.f32 %v735_v15, %v1694_v6  ;;  %v744_v9 = vmul.f32 %v735_v15, %v1696_v7 }
 0x151   : > { %v747_v19 = vadd.f32 %v743_v8, %v741_v2  ;;  %v748_v20 = vadd.f32 %v744_v9, %v742_v4 }
 0x153   : > { %v749_v3 = vadd.f32 %v747_v19, %v745_v16  ;;  %v750_v0 = vadd.f32 %v748_v20, %v746_v18 }
 0x155   : > { %v751_v1 = vmul.f32 0.25, %v749_v3  ;;  %v752_v21 = vmul.f32 0.25, %v750_v0 }
 0x157   : > { %753 = vst [vmem:[%s492_s18] sm:$0xff] %v751_v1 }
 0x158   : > { %754 = vst [vmem:[%s492_s18 + $0x8] sm:$0xff] %v752_v21 }
 0x159   : > { %1355 = shalt.err (!%p1352_p8)
}
 0x15a   : > { %1054 = dma.vmem_to_hbm [thread:$0]  (%p1537_p3), %s770_s27, 256, %s772_s9, %s756_s26  }
 0x15b PF: > { %s1963_s19 = sld [smem:[#allocation25_spill]] }
 0x15c   : > { %s1965_s11 = sld [smem:[#allocation28_spill]] }
 0x161   : > { %s783_s21 = sand.u32 1, %s1963_s19  }
 0x162   : > { %p1966_p10 = scmp.ge.s32.totalorder %s1965_s11, 2  ;;  %s784_s14 = scalar_lea.sflag [#allocation4], %s783_s21 }
 0x164   : > { %p1083_p12 = pnand %p1966_p10, %p1500_p6 }
 0x166   : > { %p1084_p0 = pneg %p1083_p12 }
 0x168   : > { %1397 = dma.done.wait (%p1084_p0), %s784_s14, 256  }
 0x169   : > { %1399 = vsyncadd (%p1084_p0), %s784_s14, 4294967040  ;;  %s1967_s30 = sld [smem:[#allocation30_spill]] }
 0x16a   : > { %s1968_s27 = sld [smem:[#allocation26_spill]] }
 0x16b   : > { %s1969_s28 = sld [smem:[#allocation27_spill]] }
 0x16c   : > { %s1970_s29 = sld [smem:[#allocation31_spill]] }
 0x16f   : > { %p30_p5 = scmp.ge.s32.totalorder %s1967_s30, 4  }
 0x171   :  { %32 = sbr.rel (!%p30_p5) target bundleno = 22 (0x16), region = 152 }
 0x176   :  { %790 = vsyncpa [#allocation3], 1 }
 0x177   :  { %792 = vsyncpa [#allocation3 + $0x1], 1 }
 0x178   :  { %793 = vsyncpa [#allocation8], 1 }
 0x179   :  { %795 = vsyncpa [#allocation8 + $0x1], 1 }
 0x17a   :  { %796 = vsyncpa [#allocation11], 1 }
 0x17b   :  { %798 = vsyncpa [#allocation11 + $0x1], 1 }
 0x17c   :  { %799 = vsyncpa [#allocation4], 1 }
 0x17d   :  { %801 = vsyncpa [#allocation4 + $0x1], 1 }
 0x17e   :  { %802 = vsyncpa [#allocation5], 1 }
 0x17f   :  { %804 = vsyncpa [#allocation5 + $0x1], 1 }
 0x180   :  { %805 = vsyncpa [#allocation6], 1 }
 0x181   :  { %807 = vsyncpa [#allocation6 + $0x1], 1 }
 0x182   :  { %808 = vsyncpa [#allocation15], 1 }

</bundles_post_ra>
